<compile_context>
chip_gen: v7x
topology: tpu7x:2x2x1
jax: 0.10.0
libtpu: 0.0.40
codegen_flags: <defaults>
</compile_context>

<pallas_src>
import jax
import jax.numpy as jnp
from jax.experimental import pallas as pl
from jax.experimental.pallas import tpu as pltpu


# ----------------------------- Pallas kernel --------------------------------

def _reward_mlp_kernel(x_ref, w1_ref, b1_ref, w2_ref, b2_ref,
                       w3_ref, b3_ref, w4t_ref, b4_ref, o_ref):
    # x_ref: (TM, D_in) bf16 row tile; weights w1..w3 bf16; biases + w4t f32.
    x = x_ref[...]

    h1 = jnp.dot(x, w1_ref[...], preferred_element_type=jnp.float32) + b1_ref[...]
    h1 = jnp.maximum(h1, 0.0)                                   # ReLU (f32)

    h2 = jnp.dot(h1.astype(jnp.bfloat16), w2_ref[...],
                 preferred_element_type=jnp.float32) + b2_ref[...]
    h2 = jnp.where(h2 > 0.0, h2, 0.01 * h2)                     # LeakyReLU(0.01)

    h3 = jnp.dot(h2.astype(jnp.bfloat16), w3_ref[...],
                 preferred_element_type=jnp.float32) + b3_ref[...]
    h3 = jnp.maximum(h3, 0.0)                                   # ReLU

    # Final layer computed transposed so the output is a lane-dense (1, TM) row:
    #   q_row = w4^T @ h3^T   ->  (1, 64) @ (64, TM)
    q = jnp.dot(w4t_ref[...], h3.T, preferred_element_type=jnp.float32) + b4_ref[...]
    o_ref[...] = q                                              # (1, TM)


def reward_group_forward_pallas(x_rows, params, block_rows=512):
    """x_rows: (R, D_in) f32 rows (all groups stacked).  Returns (R,) f32."""
    R, D_in = x_rows.shape
    w1, b1, w2, b2, w3, b3, w4, b4 = params

    TM = int(block_rows)                      # multiple of 128 (lane-dense out)
    n_tiles = int(pl.cdiv(R, TM))
    R_pad = n_tiles * TM

    # Pad rows to a tile multiple; padded rows are sliced away afterwards.
    x_p = jnp.pad(x_rows, ((0, R_pad - R), (0, 0))).astype(jnp.bfloat16)

    # bf16 operands for the MXU; biases and the tiny final layer stay f32.
    w1b = w1.astype(jnp.bfloat16)
    w2b = w2.astype(jnp.bfloat16)
    w3b = w3.astype(jnp.bfloat16)
    w4t = w4.astype(jnp.float32).T            # (1, 64)
    b4s = b4.reshape(1, 1).astype(jnp.float32)

    def full(a):  # grid-invariant full-array block (stays resident in VMEM)
        return pl.BlockSpec(a.shape, lambda i, _nd=a.ndim: (0,) * _nd)

    out = pl.pallas_call(
        _reward_mlp_kernel,
        out_shape=jax.ShapeDtypeStruct((1, R_pad), jnp.float32),
        grid=(n_tiles,),
        in_specs=[
            pl.BlockSpec((TM, D_in), lambda i: (i, 0)),
            full(w1b), full(b1), full(w2b), full(b2),
            full(w3b), full(b3), full(w4t), full(b4s),
        ],
        out_specs=pl.BlockSpec((1, TM), lambda i: (0, i)),
        compiler_params=pltpu.CompilerParams(
            dimension_semantics=("parallel",)),
    )(x_p, w1b, b1, w2b, b2, w3b, b3, w4t, b4s)

    return out[0, :R]


# ------------------------------ Module glue ---------------------------------

def init_reward_network_params(key, input_shape):
    """Deterministic init of RewardNetwork params (shapes from nn.Linear)."""
    dims = [(input_shape, 64), (64, 128), (128, 64), (64, 1)]
    params = []
    for i, (d_in, d_out) in enumerate(dims):
        kw, kb = jax.random.split(jax.random.fold_in(key, i))
        bound = 1.0 / jnp.sqrt(d_in)
        w = jax.random.uniform(kw, (d_in, d_out), jnp.float32, -bound, bound)
        b = jax.random.uniform(kb, (1, d_out), jnp.float32, -bound, bound)
        params += [w, b]
    return tuple(params)


def reward_group_forward(reward_inputs, indices_groups, params, block_rows=512):
    """Mirrors RewardGroup.forward: returns a list of (B, T, 1) outputs."""
    B, T, N, Dobs = reward_inputs.shape
    M = B * T
    G = len(indices_groups)

    # Gather each group's agents, flatten (agents, obs) -> D_in, stack all
    # groups along the row dimension (weights are shared -> one big matmul).
    # TODO(synk): for very large B*T*G, this wrapper-side take/concatenate
    # materializes a second HBM copy of the activations; an in-kernel gather
    # via PrefetchScalarGridSpec would remove that traffic.
    slabs = []
    for group in indices_groups:
        gi = jnp.asarray(group, dtype=jnp.int32)
        sel = jnp.take(reward_inputs, gi, axis=2)          # (B, T, |g|, Dobs)
        slabs.append(sel.reshape(M, len(group) * Dobs))    # (M, D_in)
    x_rows = jnp.concatenate(slabs, axis=0).astype(jnp.float32)   # (G*M, D_in)

    q = reward_group_forward_pallas(x_rows, params, block_rows)   # (G*M,)
    q = q.reshape(G, B, T, 1)
    return [q[g] for g in range(G)]


def _reference_forward(reward_inputs, indices_groups, params, quantize=False):
    """Pure-JAX reference.  quantize=True mimics the kernel's bf16 operands."""
    w1, b1, w2, b2, w3, b3, w4, b4 = params
    cast = (lambda a: a.astype(jnp.bfloat16).astype(jnp.float32)) if quantize \
        else (lambda a: a)
    w1q, w2q, w3q = cast(w1), cast(w2), cast(w3)
    B, T, N, Dobs = reward_inputs.shape
    outs = []
    for group in indices_groups:
        gi = jnp.asarray(group, dtype=jnp.int32)
        x = cast(jnp.take(reward_inputs, gi, axis=2).reshape(B * T, -1))
        h1 = jnp.maximum(x @ w1q + b1, 0.0)
        z2 = cast(h1) @ w2q + b2
        h2 = jnp.where(z2 > 0.0, z2, 0.01 * z2)
        h3 = jnp.maximum(cast(h2) @ w3q + b3, 0.0)
        q = h3 @ w4 + b4
        outs.append(q.reshape(B, T, 1))
    return outs


# --------------------------------- Main --------------------------------------

if __name__ == "__main__":
    key = jax.random.PRNGKey(0)

    # Small, module-consistent shapes; chosen so the row grid has >1 tile and a
    # partially-padded final tile (block_rows=128, R = 2 groups * 2 * 72 = 288).
    B, T = 2, 72                   # batch, timesteps
    n_agents = 4
    input_shape_one_obs = 8        # per-agent observation size
    num_reward_agents = 2          # agents per indices_group
    indices_groups = [[0, 1], [2, 3]]
    input_shape = input_shape_one_obs * num_reward_agents   # 16

    k_in, k_par = jax.random.split(key)
    reward_inputs = jax.random.normal(
        k_in, (B, T, n_agents, input_shape_one_obs), dtype=jnp.float32)

    params = init_reward_network_params(k_par, input_shape)

    outputs = reward_group_forward(reward_inputs, indices_groups, params,
                                   block_rows=128)
    outputs = [jax.block_until_ready(o) for o in outputs]

    refs_bf16 = _reference_forward(reward_inputs, indices_groups, params, quantize=True)
    refs_f32 = _reference_forward(reward_inputs, indices_groups, params, quantize=False)
    for o, rq, rf in zip(outputs, refs_bf16, refs_f32):
        assert o.shape == (B, T, 1)
        # Tight check vs a reference with matching bf16 operand quantization.
        assert jnp.allclose(o, rq, atol=1e-3, rtol=1e-3)
        # Loose check vs the pure-f32 module semantics (bf16 rounding allowed).
        assert jnp.allclose(o, rf, atol=5e-2, rtol=5e-2)

    print("KERNEL_OK")
</pallas_src>

<mosaic_0001>
module attributes {stable_mosaic.version = 11 : i64} {
  func.func @_reward_mlp_kernel(%arg0: i32, %arg1: memref<128x16xbf16, #tpu.memory_space<vmem>>, %arg2: memref<16x64xbf16, #tpu.memory_space<vmem>>, %arg3: memref<1x64xf32, #tpu.memory_space<vmem>>, %arg4: memref<64x128xbf16, #tpu.memory_space<vmem>>, %arg5: memref<1x128xf32, #tpu.memory_space<vmem>>, %arg6: memref<128x64xbf16, #tpu.memory_space<vmem>>, %arg7: memref<1x64xf32, #tpu.memory_space<vmem>>, %arg8: memref<1x64xf32, #tpu.memory_space<vmem>>, %arg9: memref<1x1xf32, #tpu.memory_space<vmem>>, %arg10: memref<1x128xf32, #tpu.memory_space<vmem>>) attributes {dimension_semantics = [#tpu.dimension_semantics<parallel>], iteration_bounds = array<i64: 3>, scalar_prefetch = 0 : i64, scratch_operands = 0 : i64, tpu.core_type = #tpu.core_type<tc>, window_params = [{transform_indices = @transform_0, window_bounds = array<i64: 128, 16>}, {pipeline_mode = #tpu.pipeline_mode<synchronous>, transform_indices = @transform_1, window_bounds = array<i64: 16, 64>}, {pipeline_mode = #tpu.pipeline_mode<synchronous>, transform_indices = @transform_2, window_bounds = array<i64: 1, 64>}, {pipeline_mode = #tpu.pipeline_mode<synchronous>, transform_indices = @transform_3, window_bounds = array<i64: 64, 128>}, {pipeline_mode = #tpu.pipeline_mode<synchronous>, transform_indices = @transform_4, window_bounds = array<i64: 1, 128>}, {pipeline_mode = #tpu.pipeline_mode<synchronous>, transform_indices = @transform_5, window_bounds = array<i64: 128, 64>}, {pipeline_mode = #tpu.pipeline_mode<synchronous>, transform_indices = @transform_6, window_bounds = array<i64: 1, 64>}, {pipeline_mode = #tpu.pipeline_mode<synchronous>, transform_indices = @transform_7, window_bounds = array<i64: 1, 64>}, {pipeline_mode = #tpu.pipeline_mode<synchronous>, transform_indices = @transform_8, window_bounds = array<i64: 1, 1>}, {transform_indices = @transform_9, window_bounds = array<i64: 1, 128>}]} {
    %c0 = arith.constant 0 : index
    %c0_0 = arith.constant 0 : index
    %0 = vector.load %arg1[%c0, %c0_0] : memref<128x16xbf16, #tpu.memory_space<vmem>>, vector<128x16xbf16>
    %c0_1 = arith.constant 0 : index
    %c0_2 = arith.constant 0 : index
    %1 = vector.load %arg2[%c0_1, %c0_2] : memref<16x64xbf16, #tpu.memory_space<vmem>>, vector<16x64xbf16>
    %cst = arith.constant dense<0.000000e+00> : vector<128x64xf32>
    %2 = tpu.matmul %0, %1, %cst {dimension_numbers = #tpu.dot_dimension_numbers<[1], [0], [0], [1], [0, 0, 1, 1], [], []>} : vector<128x16xbf16>, vector<16x64xbf16>, vector<128x64xf32> -> vector<128x64xf32>
    %c0_3 = arith.constant 0 : index
    %c0_4 = arith.constant 0 : index
    %3 = vector.load %arg3[%c0_3, %c0_4] : memref<1x64xf32, #tpu.memory_space<vmem>>, vector<1x64xf32>
    %4 = vector.broadcast %3 : vector<1x64xf32> to vector<128x64xf32>
    %5 = arith.addf %2, %4 : vector<128x64xf32>
    %cst_5 = arith.constant 0.000000e+00 : f32
    %6 = vector.broadcast %cst_5 : f32 to vector<128x64xf32>
    %7 = arith.maximumf %5, %6 : vector<128x64xf32>
    %8 = arith.truncf %7 : vector<128x64xf32> to vector<128x64xbf16>
    %c0_6 = arith.constant 0 : index
    %c0_7 = arith.constant 0 : index
    %9 = vector.load %arg4[%c0_6, %c0_7] : memref<64x128xbf16, #tpu.memory_space<vmem>>, vector<64x128xbf16>
    %cst_8 = arith.constant dense<0.000000e+00> : vector<128x128xf32>
    %10 = tpu.matmul %8, %9, %cst_8 {dimension_numbers = #tpu.dot_dimension_numbers<[1], [0], [0], [1], [0, 0, 1, 1], [], []>} : vector<128x64xbf16>, vector<64x128xbf16>, vector<128x128xf32> -> vector<128x128xf32>
    %c0_9 = arith.constant 0 : index
    %c0_10 = arith.constant 0 : index
    %11 = vector.load %arg5[%c0_9, %c0_10] : memref<1x128xf32, #tpu.memory_space<vmem>>, vector<1x128xf32>
    %12 = vector.broadcast %11 : vector<1x128xf32> to vector<128x128xf32>
    %13 = arith.addf %10, %12 : vector<128x128xf32>
    %cst_11 = arith.constant 0.000000e+00 : f32
    %14 = vector.broadcast %cst_11 : f32 to vector<128x128xf32>
    %15 = arith.cmpf ogt, %13, %14 : vector<128x128xf32>
    %cst_12 = arith.constant 0.00999999977 : f32
    %16 = vector.broadcast %cst_12 : f32 to vector<128x128xf32>
    %17 = arith.mulf %16, %13 : vector<128x128xf32>
    %18 = arith.select %15, %13, %17 : vector<128x128xi1>, vector<128x128xf32>
    %19 = arith.truncf %18 : vector<128x128xf32> to vector<128x128xbf16>
    %c0_13 = arith.constant 0 : index
    %c0_14 = arith.constant 0 : index
    %20 = vector.load %arg6[%c0_13, %c0_14] : memref<128x64xbf16, #tpu.memory_space<vmem>>, vector<128x64xbf16>
    %cst_15 = arith.constant dense<0.000000e+00> : vector<128x64xf32>
    %21 = tpu.matmul %19, %20, %cst_15 {dimension_numbers = #tpu.dot_dimension_numbers<[1], [0], [0], [1], [0, 0, 1, 1], [], []>} : vector<128x128xbf16>, vector<128x64xbf16>, vector<128x64xf32> -> vector<128x64xf32>
    %c0_16 = arith.constant 0 : index
    %c0_17 = arith.constant 0 : index
    %22 = vector.load %arg7[%c0_16, %c0_17] : memref<1x64xf32, #tpu.memory_space<vmem>>, vector<1x64xf32>
    %23 = vector.broadcast %22 : vector<1x64xf32> to vector<128x64xf32>
    %24 = arith.addf %21, %23 : vector<128x64xf32>
    %cst_18 = arith.constant 0.000000e+00 : f32
    %25 = vector.broadcast %cst_18 : f32 to vector<128x64xf32>
    %26 = arith.maximumf %24, %25 : vector<128x64xf32>
    %c0_19 = arith.constant 0 : index
    %c0_20 = arith.constant 0 : index
    %27 = vector.load %arg8[%c0_19, %c0_20] : memref<1x64xf32, #tpu.memory_space<vmem>>, vector<1x64xf32>
    %28 = tpu.transpose %26, [1, 0] : vector<128x64xf32> -> vector<64x128xf32>
    %cst_21 = arith.constant dense<0.000000e+00> : vector<1x128xf32>
    %29 = tpu.matmul %27, %28, %cst_21 {dimension_numbers = #tpu.dot_dimension_numbers<[1], [0], [0], [1], [0, 0, 1, 1], [], []>} : vector<1x64xf32>, vector<64x128xf32>, vector<1x128xf32> -> vector<1x128xf32>
    %c0_22 = arith.constant 0 : index
    %c0_23 = arith.constant 0 : index
    %30 = vector.load %arg9[%c0_22, %c0_23] : memref<1x1xf32, #tpu.memory_space<vmem>>, vector<1x1xf32>
    %31 = vector.broadcast %30 : vector<1x1xf32> to vector<1x128xf32>
    %32 = arith.addf %29, %31 : vector<1x128xf32>
    %c0_24 = arith.constant 0 : index
    %c0_25 = arith.constant 0 : index
    %33 = vector.load %arg10[%c0_24, %c0_25] : memref<1x128xf32, #tpu.memory_space<vmem>>, vector<1x128xf32>
    tpu.vector_store %arg10[%c0_24, %c0_25], %32 {strides = array<i32>} : memref<1x128xf32, #tpu.memory_space<vmem>>, vector<1x128xf32>,
    return
  }
  func.func @transform_0(%arg0: i32) -> (i32, i32) {
    %c0_i32 = arith.constant 0 : i32
    %c0_i32_0 = arith.constant 0 : i32
    return %arg0, %c0_i32 : i32, i32
  }
  func.func @transform_1(%arg0: i32) -> (i32, i32) {
    %c0_i32 = arith.constant 0 : i32
    %c0_i32_0 = arith.constant 0 : i32
    %c0_i32_1 = arith.constant 0 : i32
    return %c0_i32, %c0_i32_0 : i32, i32
  }
  func.func @transform_2(%arg0: i32) -> (i32, i32) {
    %c0_i32 = arith.constant 0 : i32
    %c0_i32_0 = arith.constant 0 : i32
    %c0_i32_1 = arith.constant 0 : i32
    return %c0_i32, %c0_i32_0 : i32, i32
  }
  func.func @transform_3(%arg0: i32) -> (i32, i32) {
    %c0_i32 = arith.constant 0 : i32
    %c0_i32_0 = arith.constant 0 : i32
    %c0_i32_1 = arith.constant 0 : i32
    return %c0_i32, %c0_i32_0 : i32, i32
  }
  func.func @transform_4(%arg0: i32) -> (i32, i32) {
    %c0_i32 = arith.constant 0 : i32
    %c0_i32_0 = arith.constant 0 : i32
    %c0_i32_1 = arith.constant 0 : i32
    return %c0_i32, %c0_i32_0 : i32, i32
  }
  func.func @transform_5(%arg0: i32) -> (i32, i32) {
    %c0_i32 = arith.constant 0 : i32
    %c0_i32_0 = arith.constant 0 : i32
    %c0_i32_1 = arith.constant 0 : i32
    return %c0_i32, %c0_i32_0 : i32, i32
  }
  func.func @transform_6(%arg0: i32) -> (i32, i32) {
    %c0_i32 = arith.constant 0 : i32
    %c0_i32_0 = arith.constant 0 : i32
    %c0_i32_1 = arith.constant 0 : i32
    return %c0_i32, %c0_i32_0 : i32, i32
  }
  func.func @transform_7(%arg0: i32) -> (i32, i32) {
    %c0_i32 = arith.constant 0 : i32
    %c0_i32_0 = arith.constant 0 : i32
    %c0_i32_1 = arith.constant 0 : i32
    return %c0_i32, %c0_i32_0 : i32, i32
  }
  func.func @transform_8(%arg0: i32) -> (i32, i32) {
    %c0_i32 = arith.constant 0 : i32
    %c0_i32_0 = arith.constant 0 : i32
    %c0_i32_1 = arith.constant 0 : i32
    return %c0_i32, %c0_i32_0 : i32, i32
  }
  func.func @transform_9(%arg0: i32) -> (i32, i32) {
    %c0_i32 = arith.constant 0 : i32
    %c0_i32_0 = arith.constant 0 : i32
    return %c0_i32, %arg0 : i32, i32
  }
}

</mosaic_0001>

<bundles_post_ra>
// kernel: tpu_custom_call.1
= control target key start
LH: loop header
LB: loop body
LE: loop exit
PB: predicated region body
PF: predicated region fallthrough
CT: control target
= control target key end

     0   :  { %s1817_s0 = inlined_call_operand.vmem [shape: bf16[384,16], index: 0, kind: input, shape index: {}]   ;;  %s1818_s1 = inlined_call_operand.vmem [shape: bf16[16,64], index: 1, kind: input, shape index: {}]   ;;  %s1819_s2 = inlined_call_operand.vmem [shape: f32[1,64], index: 2, kind: input, shape index: {}]   ;;  %s1820_s3 = inlined_call_operand.vmem [shape: bf16[64,128], index: 3, kind: input, shape index: {}]   ;;  %s1821_s4 = inlined_call_operand.vmem [shape: f32[1,128], index: 4, kind: input, shape index: {}]   ;;  %s1822_s5 = inlined_call_operand.vmem [shape: bf16[128,64], index: 5, kind: input, shape index: {}]   ;;  %s1823_s6 = inlined_call_operand.vmem [shape: f32[1,64], index: 6, kind: input, shape index: {}]   ;;  %s1824_s7 = inlined_call_operand.vmem [shape: f32[1,64], index: 7, kind: input, shape index: {}]   ;;  %s1825_s8 = inlined_call_operand.<no memory space> [shape: f32[1,1], index: 8, kind: input, shape index: {}]   ;;  %s1826_s9 = inlined_call_operand.hbm [shape: f32[1,384], index: 9, kind: output, shape index: {}]  }
   0x1   :  { %v14_v0 = vstv %s1825_s8 }
   0x2   :  { %15 = vst [vmem:[#allocation2] sm:$0x1] %v14_v0 }
   0x3   :  { %16 = vsyncpa [#allocation4], 0 }
   0x4   :  { %18 = vsyncpa [#allocation4 + $0x1], 0  ;;  %s1602_s11 = smov 0   ;;  %s1604_s12 = smov 0  }
   0x5   :  { %s1606_s13 = smov 0   ;;  %s1608_s14 = smov 0  }
   0x6 LB: > { %s1153_s8 = sadd.s32 4294967295, %s1542_s14   ;;  %s1154_s15 = sadd.s32 4294967294, %s1542_s14   ;;  %s1542_s14 = sphi %s1608_s14, %s1834_s14   ;;  %s1538_s13 = sphi %s1606_s13, %s1833_s13   ;;  %s1534_s12 = sphi %s1604_s12, %s1832_s12   ;;  %s1530_s11 = sphi %s1602_s11, %s1831_s11  }
   0x7   : > { %s1625_s16 = sadd.s32 1, %s1542_s14   ;;  %s225_s17 = sadd.s32 1, %s1538_s13 }
   0x8   : > { %s222_s18 = ssub.s32 %s1542_s14, %s1625_s16  ;;  %p235_p0 = scmp.ne.s32.totalorder %s1538_s13, %s1534_s12 }
   0x9   : > { %p223_p1 = scmp.eq.s32.totalorder %s222_s18, 0  ;;  %p236_p2 = scmp.eq.s32.totalorder %s1153_s8, 2 }
   0xa   : > { %p241_p3 = scmp.ne.s32.totalorder %s1534_s12, %s1530_s11  ;;  %p242_p4 = scmp.eq.s32.totalorder %s1154_s15, 2 }
   0xb   : > { %s1635_s19 = scalar_select %p223_p1, %s1538_s13, %s225_s17  }
   0xc   : > { %p1637_p5 = por %p236_p2, %p235_p0  ;;  %p1641_p6 = por %p242_p4, %p241_p3 }
   0xd   : > { %p1157_p7 = scmp.ge.s32.totalorder %s1542_s14, 1  ;;  %p293_p8 = scmp.lt.s32.totalorder %s1542_s14, 4 }
   0xf   : > { %p294_p9 = pnand %p1157_p7, %p293_p8 }
  0x10   : > { %v1459_v1 = vld [vmem:[%s1818_s1] sm:$0xff] (!%p294_p9)   ;;  %s1650_s24 = sshll.u32 (!%p294_p9), %s1153_s8, 4  ;;  %v1469_v3 = vld [vmem:[%s1820_s3 + $0x8] sm:$0xff] (!%p294_p9)   ;;  %vm406_vm0 = vcmask (!%p294_p9), 130048   ;;  %v1470_v12 = vld [vmem:[%s1820_s3 + $0x10] sm:$0xff] (!%p294_p9)   ;;  %vm591_vm1 = vcmask (!%p294_p9), 523264  }
  0x11   : > { %297 = sbr.rel (%p294_p9) target bundleno = 987 (0x3db), region = 56  ;;  %p329_p10 = scmp.lt.s32.totalorder (!%p294_p9), %s1650_s24, 47  ;;  %1274 = vmatprep.subr.bf16.mxu0 (!%p294_p9), %v1459_v1  ;;  %v1468_v2 = vld [vmem:[%s1820_s3] sm:$0xff] (!%p294_p9)   ;;  %v1471_v13 = vld [vmem:[%s1820_s3 + $0x18] sm:$0xff] (!%p294_p9)   ;;  %v1473_v15 = vld [vmem:[%s1822_s5 + $0x8] sm:$0xff] (!%p294_p9)  }
  0x12   : > { %1275 = vmatpush3.bf16.msra.mxu0 (!%p294_p9), %v1459_v1  ;;  %1292 = vmatprep.subr.bf16.mxu1 (!%p294_p9), %v1468_v2  ;;  %v1472_v14 = vld [vmem:[%s1822_s5] sm:$0xff] (!%p294_p9)   ;;  %v1474_v16 = vld [vmem:[%s1822_s5 + $0x10] sm:$0xff] (!%p294_p9)   ;;  %v1475_v17 = vld [vmem:[%s1822_s5 + $0x18] sm:$0xff] (!%p294_p9)   ;;  %s326_s22 = sand.u32 (!%p294_p9), 1, %s1534_s12   ;;  %s1775_s28 = scalar_lea.hbm (!%p294_p9), %s1826_s9, %s1650_s24 }
  0x13   : > { %1293 = vmatpush3.bf16.msra.mxu1 (!%p294_p9), %v1468_v2  ;;  %1316 = vmatprep.subr.bf16.mxu0 (!%p294_p9), %v1472_v14  ;;  %v1476_v18 = vld [vmem:[%s1822_s5 + $0x20] sm:$0xff] (!%p294_p9)   ;;  %v1477_v19 = vld [vmem:[%s1822_s5 + $0x28] sm:$0xff] (!%p294_p9)   ;;  %s327_s23 = scalar_lea.vmem (!%p294_p9), [#allocation3], %s326_s22  ;;  %s1087_s29 = scalar_lea.sflag (!%p294_p9), [#allocation4], %s326_s22 }
  0x14   : > { %1294 = vmatprep.subr.bf16.mxu1 (!%p294_p9), %v1469_v3  ;;  %v1160_v20 = vld [vmem:[%s1819_s2] ss:$0 sm:$0xff] (!%p294_p9)  ;;  %s1099_s25 = sshll.u32 (!%p294_p9), %s327_s23, 4  ;;  %s1548_s10 = smov (!%p294_p9), [#allocation3]   ;;  %s1777_s25 = int_to_ptr.vmem [resolvable:$true] %s1099_s25 }
  0x15   : > { %s1484_s8 = sshll.u32 (!%p294_p9), %s1548_s10, 4  ;;  %s1485_s8 = int_to_ptr.vmem [resolvable:$false] %s1484_s8 }
  0x16   : > { %p1487_p0 = scmp.lt.s32.totalorder (!%p294_p9), %s1777_s25, %s1485_s8 }
  0x17   : > { %1295 = vmatpush3.bf16.msra.mxu1 (!%p294_p9), %v1469_v3 }
  0x18   : > { %s330_s27 = scalar_select %p329_p10, %s1650_s24, 47  ;;  %1296 = vmatprep.subr.bf16.mxu1 %v1470_v12 }
  0x1a   : > { %s1159_s30 = sshll.u32 %s330_s27, 2 }
  0x1b   : > { %s332_s15 = scalar_lea.vmem %s1817_s0, %s1159_s30  ;;  %1297 = vmatpush3.bf16.msra.mxu1 %v1470_v12  ;;  %s1480_s30 = scalar_lea.vmem %s1777_s25, 16 }
  0x1c   : > { %v1460_v4 = vld [vmem:[%s332_s15] sm:$0xff]   ;;  %v1461_v5 = vld [vmem:[%s332_s15 + $0x8] sm:$0xff]   ;;  %v1462_v6 = vld [vmem:[%s332_s15 + $0x10] sm:$0xff]   ;;  %1298 = vmatprep.subr.bf16.mxu1 %v1471_v13  ;;  %p1481_p11 = scmp.ne.s32.totalorder %s1777_s25, %s1480_s30 }
  0x1d   : > { %1276 = vmatprep.mubr.msk.bf16.mxu0 %vm406_vm0, %v1460_v4  ;;  %v1463_v7 = vld [vmem:[%s332_s15 + $0x18] sm:$0xff]   ;;  %v1464_v8 = vld [vmem:[%s332_s15 + $0x20] sm:$0xff]   ;;  %v1465_v9 = vld [vmem:[%s332_s15 + $0x28] sm:$0xff]  }
  0x1e   : > { %1277 = vmatmul.mubr.msk.bf16.vlgmr.msra.gmra.mrb[0].mxu0 %vm406_vm0, %v1461_v5  ;;  %v1466_v10 = vld [vmem:[%s332_s15 + $0x30] sm:$0xff]   ;;  %v1467_v11 = vld [vmem:[%s332_s15 + $0x38] sm:$0xff]   ;;  %p1482_p12 = pnand %p1481_p11, %p1637_p5  ;;  %s1486_s15 = scalar_lea.vmem %s1485_s8, 32 }
  0x1f   : > { %1280 = vmatprep.mubr.msk.bf16.mxu0 %vm406_vm0, %v1462_v6  ;;  %1299 = vmatpush3.bf16.msra.mxu1 %v1471_v13  ;;  %v1478_v13 = vld [vmem:[%s1822_s5 + $0x30] sm:$0xff]   ;;  %p1488_p1 = scmp.lt.s32.totalorder %s1486_s15, %s1480_s30 }
  0x20   : > { %1317 = vmatpush3.bf16.msra.mxu0 %v1472_v14  ;;  %v1479_v14 = vld [vmem:[%s1822_s5 + $0x38] sm:$0xff]   ;;  %p1483_p13 = pneg %p1482_p12 }
  0x21   : > { %1318 = vmatprep.subr.bf16.mxu0 %v1473_v15  ;;  %p1489_p2 = por %p1488_p1, %p1487_p0 }
  0x23   : > { %p1490_p3 = pnand %p1489_p2, %p1483_p13 }
  0x24   : > { %1319 = vmatpush3.bf16.msra.mxu0 %v1473_v15  ;;  %v1715_v15 = vld [vmem:[%s1821_s4] ss:$0 sm:$0xff] }
  0x25   : > { %1320 = vmatprep.subr.bf16.mxu0 %v1474_v16 }
  0x26   : > { %1281 = vmatmul.mubr.msk.bf16.gmra.mrb[4].mxu0 %vm406_vm0, %v1463_v7 }
  0x27   : > { %1284 = vmatprep.mubr.msk.bf16.mxu0 %vm406_vm0, %v1464_v8 }
  0x28   : > { %1321 = vmatpush3.bf16.msra.mxu0 %v1474_v16 }
  0x29   : > { %1322 = vmatprep.subr.bf16.mxu0 %v1475_v17 }
  0x2c   : > { %1323 = vmatpush3.bf16.msra.mxu0 %v1475_v17 }
  0x2d   : > { %1324 = vmatprep.subr.bf16.mxu0 %v1476_v18 }
  0x2e   : > { %1285 = vmatmul.mubr.msk.bf16.gmra.mrb[8].mxu0 %vm406_vm0, %v1465_v9 }
  0x2f   : > { %1288 = vmatprep.mubr.msk.bf16.mxu0 %vm406_vm0, %v1466_v10 }
  0x30   : > { %1325 = vmatpush3.bf16.msra.mxu0 %v1476_v18 }
  0x31   : > { %1326 = vmatprep.subr.bf16.mxu0 %v1477_v19 }
  0x34   : > { %1327 = vmatpush3.bf16.msra.mxu0 %v1477_v19 }
  0x35   : > { %1328 = vmatprep.subr.bf16.mxu0 %v1478_v13 }
  0x36   : > { %1289 = vmatmul.mubr.msk.bf16.gmra.mrb[12].mxu0 %vm406_vm0, %v1467_v11 }
  0x38   : > { %1329 = vmatpush3.bf16.msra.mxu0 %v1478_v13 }
  0x39   : > { %1330 = vmatprep.subr.bf16.mxu0 %v1479_v14 }
  0x3c   : > { %1331 = vmatpush3.bf16.msra.mxu0 %v1479_v14 }
  0xf1   : > { %v1278_v21 = vpop.f32.mrb[0].mxu0 }
  0xf2   : > { %v474_v22 = vadd.f32 %v1278_v21, %v1160_v20  ;;  %v465_v23 = vpop.f32.mrb[1].mxu0 }
  0xf3   : > { %v466_v24 = vadd.f32 %v1160_v20, %v465_v23  ;;  %v1279_v25 = vpop.f32.mrb[2].mxu0 }
  0xf4   : > { %v477_v26 = vadd.f32 %v1279_v25, %v1160_v20  ;;  %v468_v27 = vpop.f32.mrb[3].mxu0  ;;  %v530_v29 = vmax.f32 %v474_v22, 0.0 }
  0xf5   : > { %v469_v28 = vadd.f32 %v1160_v20, %v468_v27  ;;  %v528_v31 = vmax.f32 %v466_v24, 0.0 }
  0xf6   : > { %v531_v30 = vmax.f32 %v477_v26, 0.0 }
  0xf7   : > { %v529_v32 = vmax.f32 %v469_v28, 0.0 }
  0xf8   : > { %v545_v33 = vpack.c.bf16 %v531_v30, %v530_v29 }
  0xf9   : > { %v1282_v34 = vpop.f32.mrb[4].mxu0  ;;  %v544_v35 = vpack.c.bf16 %v529_v32, %v528_v31 }
  0xfa   : > { %v490_v36 = vadd.f32 %v1282_v34, %v1160_v20  ;;  %v481_v37 = vpop.f32.mrb[5].mxu0 }
  0xfb   : > { %v482_v38 = vadd.f32 %v1160_v20, %v481_v37  ;;  %v1283_v39 = vpop.f32.mrb[6].mxu0  ;;  %1300 = vmatprep.mubr.msk.bf16.mxu1 %vm591_vm1, %v544_v35 }
  0xfc   : > { %v534_v40 = vmax.f32 %v490_v36, 0.0  ;;  %v493_v41 = vadd.f32 %v1283_v39, %v1160_v20  ;;  %v484_v42 = vpop.f32.mrb[7].mxu0  ;;  %1301 = vmatmul.mubr.msk.bf16.vlgmr.msra.gmra.mrb[0].mxu1 %vm591_vm1, %v545_v33 }
  0xfd   : > { %v532_v43 = vmax.f32 %v482_v38, 0.0  ;;  %v485_v44 = vadd.f32 %v1160_v20, %v484_v42 }
  0xfe   : > { %v535_v45 = vmax.f32 %v493_v41, 0.0 }
  0xff   : > { %v533_v46 = vmax.f32 %v485_v44, 0.0 }
 0x100   : > { %v547_v47 = vpack.c.bf16 %v535_v45, %v534_v40 }
 0x101   : > { %v546_v48 = vpack.c.bf16 %v533_v46, %v532_v43  ;;  %v1286_v49 = vpop.f32.mrb[8].mxu0 }
 0x102   : > { %v506_v50 = vadd.f32 %v1286_v49, %v1160_v20  ;;  %v497_v51 = vpop.f32.mrb[9].mxu0 }
 0x103   : > { %1304 = vmatprep.mubr.msk.bf16.mxu1 %vm591_vm1, %v546_v48  ;;  %v498_v52 = vadd.f32 %v1160_v20, %v497_v51  ;;  %v1287_v53 = vpop.f32.mrb[10].mxu0 }
 0x104   : > { %v538_v54 = vmax.f32 %v506_v50, 0.0  ;;  %1305 = vmatmul.mubr.msk.bf16.gmra.mrb[4].mxu1 %vm591_vm1, %v547_v47  ;;  %v509_v55 = vadd.f32 %v1287_v53, %v1160_v20  ;;  %v500_v56 = vpop.f32.mrb[11].mxu0 }
 0x105   : > { %v536_v57 = vmax.f32 %v498_v52, 0.0  ;;  %v501_v58 = vadd.f32 %v1160_v20, %v500_v56 }
 0x106   : > { %v539_v59 = vmax.f32 %v509_v55, 0.0 }
 0x107   : > { %v537_v60 = vmax.f32 %v501_v58, 0.0 }
 0x108   : > { %v549_v61 = vpack.c.bf16 %v539_v59, %v538_v54 }
 0x109   : > { %v548_v62 = vpack.c.bf16 %v537_v60, %v536_v57  ;;  %v1290_v63 = vpop.f32.mrb[12].mxu0 }
 0x10a   : > { %v522_v0 = vadd.f32 %v1290_v63, %v1160_v20  ;;  %v513_v1 = vpop.f32.mrb[13].mxu0 }
 0x10b   : > { %1308 = vmatprep.mubr.msk.bf16.mxu1 %vm591_vm1, %v548_v62  ;;  %v514_v2 = vadd.f32 %v1160_v20, %v513_v1  ;;  %v1291_v3 = vpop.f32.mrb[14].mxu0 }
 0x10c   : > { %1309 = vmatmul.mubr.msk.bf16.gmra.mrb[8].mxu1 %vm591_vm1, %v549_v61  ;;  %v542_v4 = vmax.f32 %v522_v0, 0.0  ;;  %v525_v5 = vadd.f32 %v1291_v3, %v1160_v20  ;;  %v516_v6 = vpop.f32.mrb[15].mxu0 }
 0x10d   : > { %v540_v7 = vmax.f32 %v514_v2, 0.0  ;;  %v517_v8 = vadd.f32 %v1160_v20, %v516_v6 }
 0x10e   : > { %v543_v9 = vmax.f32 %v525_v5, 0.0 }
 0x10f   : > { %v541_v10 = vmax.f32 %v517_v8, 0.0 }
 0x110   : > { %v551_v11 = vpack.c.bf16 %v543_v9, %v542_v4 }
 0x111   : > { %v550_v12 = vpack.c.bf16 %v541_v10, %v540_v7 }
 0x113   : > { %1312 = vmatprep.mubr.msk.bf16.mxu1 %vm591_vm1, %v550_v12 }
 0x114   : > { %1313 = vmatmul.mubr.msk.bf16.gmra.mrb[12].mxu1 %vm591_vm1, %v551_v11 }
 0x1cf   : > { %v1302_v16 = vpop.f32.mrb[0].mxu1 }
 0x1d0   : > { %v659_v17 = vadd.f32 %v1302_v16, %v1715_v15  ;;  %v650_v18 = vpop.f32.mrb[1].mxu1 }
 0x1d1   : > { %v651_v19 = vadd.f32 %v1715_v15, %v650_v18  ;;  %v1303_v20 = vpop.f32.mrb[2].mxu1 }
 0x1d2   : > { %v731_v21 = vmul.f32 0.01, %v659_v17  ;;  %v662_v22 = vadd.f32 %v1303_v20, %v1715_v15  ;;  %v653_v23 = vpop.f32.mrb[3].mxu1  ;;  %vm715_vm2 = vcmp.gt.f32.partialorder %v659_v17, 0.0 }
 0x1d3   : > { %v729_v24 = vmul.f32 0.01, %v651_v19  ;;  %v654_v25 = vadd.f32 %v1715_v15, %v653_v23  ;;  %vm713_vm3 = vcmp.gt.f32.partialorder %v651_v19, 0.0 }
 0x1d4   : > { %vm716_vm4 = vcmp.gt.f32.partialorder %v662_v22, 0.0  ;;  %v732_v26 = vmul.f32 0.01, %v662_v22  ;;  %v747_v28 = vsel %vm715_vm2, %v659_v17, %v731_v21 }
 0x1d5   : > { %vm714_vm5 = vcmp.gt.f32.partialorder %v654_v25, 0.0  ;;  %v730_v27 = vmul.f32 0.01, %v654_v25  ;;  %v745_v32 = vsel %vm713_vm3, %v651_v19, %v729_v24  ;;  %vm1545_vm3 = vmmov 0  }
 0x1d6   : > { %v748_v29 = vsel %vm716_vm4, %v662_v22, %v732_v26  ;;  %v1546_v26 = vmov 0.0   ;;  %vm1739_vm4 = vmpackc.low %vm591_vm1, %vm591_vm1 }
 0x1d7   : > { %v762_v30 = vpack.c.bf16 %v748_v29, %v747_v28  ;;  %v1306_v31 = vpop.f32.mrb[4].mxu1  ;;  %v746_v33 = vsel %vm714_vm5, %v654_v25, %v730_v27  ;;  %v1544_v25 = vmov 0.0|0.0   ;;  %1380 = vmatprep.mubr.msk.f32.mxu1 %vm1545_vm3, %v1546_v26  ;;  %v954_v27 = vld [vmem:[#allocation2] sm:$0x1] }
 0x1d8   : > { %v675_v34 = vadd.f32 %v1306_v31, %v1715_v15  ;;  %v666_v35 = vpop.f32.mrb[5].mxu1  ;;  %v761_v36 = vpack.c.bf16 %v746_v33, %v745_v32  ;;  %1383 = vmatprep.subr.bf16.mxu1 %v1544_v25  ;;  %v1191_v28 = vld [vmem:[%s1823_s6] ss:$0 sm:$0xff] }
 0x1d9   : > { %v667_v37 = vadd.f32 %v1715_v15, %v666_v35  ;;  %v1307_v38 = vpop.f32.mrb[6].mxu1 }
 0x1da   : > { %vm719_vm6 = vcmp.gt.f32.partialorder %v675_v34, 0.0  ;;  %v735_v39 = vmul.f32 0.01, %v675_v34  ;;  %v678_v40 = vadd.f32 %v1307_v38, %v1715_v15  ;;  %v669_v41 = vpop.f32.mrb[7].mxu1  ;;  %1332 = vmatprep.mubr.bf16.mxu0 %v761_v36 }
 0x1db   : > { %vm717_vm7 = vcmp.gt.f32.partialorder %v667_v37, 0.0  ;;  %v733_v42 = vmul.f32 0.01, %v667_v37  ;;  %v670_v43 = vadd.f32 %v1715_v15, %v669_v41  ;;  %1333 = vmatmul.mubr.bf16.vlgmr.msra.gmra.mrb[16].mxu0 %v762_v30 }
 0x1dc   : > { %vm720_vm8 = vcmp.gt.f32.partialorder %v678_v40, 0.0  ;;  %v736_v44 = vmul.f32 0.01, %v678_v40  ;;  %v751_v45 = vsel %vm719_vm6, %v675_v34, %v735_v39 }
 0x1dd   : > { %vm718_vm9 = vcmp.gt.f32.partialorder %v670_v43, 0.0  ;;  %v734_v46 = vmul.f32 0.01, %v670_v43  ;;  %v749_v47 = vsel %vm717_vm7, %v667_v37, %v733_v42 }
 0x1de   : > { %v752_v48 = vsel %vm720_vm8, %v678_v40, %v736_v44 }
 0x1df   : > { %v1310_v49 = vpop.f32.mrb[8].mxu1  ;;  %v750_v50 = vsel %vm718_vm9, %v670_v43, %v734_v46  ;;  %v764_v51 = vpack.c.bf16 %v752_v48, %v751_v45 }
 0x1e0   : > { %v691_v52 = vadd.f32 %v1310_v49, %v1715_v15  ;;  %v763_v53 = vpack.c.bf16 %v750_v50, %v749_v47  ;;  %v682_v54 = vpop.f32.mrb[9].mxu1 }
 0x1e1   : > { %v683_v55 = vadd.f32 %v1715_v15, %v682_v54  ;;  %v1311_v56 = vpop.f32.mrb[10].mxu1 }
 0x1e2   : > { %vm723_vm10 = vcmp.gt.f32.partialorder %v691_v52, 0.0  ;;  %v739_v57 = vmul.f32 0.01, %v691_v52  ;;  %1336 = vmatprep.mubr.bf16.mxu0 %v763_v53  ;;  %v694_v58 = vadd.f32 %v1311_v56, %v1715_v15  ;;  %v685_v59 = vpop.f32.mrb[11].mxu1 }
 0x1e3   : > { %vm721_vm11 = vcmp.gt.f32.partialorder %v683_v55, 0.0  ;;  %v737_v60 = vmul.f32 0.01, %v683_v55  ;;  %1337 = vmatmul.mubr.bf16.gmra.mrb[20].mxu0 %v764_v51  ;;  %v686_v61 = vadd.f32 %v1715_v15, %v685_v59 }
 0x1e4   : > { %vm724_vm12 = vcmp.gt.f32.partialorder %v694_v58, 0.0  ;;  %v740_v62 = vmul.f32 0.01, %v694_v58  ;;  %v755_v63 = vsel %vm723_vm10, %v691_v52, %v739_v57 }
 0x1e5   : > { %vm722_vm13 = vcmp.gt.f32.partialorder %v686_v61, 0.0  ;;  %v738_v0 = vmul.f32 0.01, %v686_v61  ;;  %v753_v1 = vsel %vm721_vm11, %v683_v55, %v737_v60 }
 0x1e6   : > { %v756_v2 = vsel %vm724_vm12, %v694_v58, %v740_v62 }
 0x1e7   : > { %v754_v3 = vsel %vm722_vm13, %v686_v61, %v738_v0  ;;  %v766_v4 = vpack.c.bf16 %v756_v2, %v755_v63  ;;  %v1314_v5 = vpop.f32.mrb[12].mxu1 }
 0x1e8   : > { %v765_v6 = vpack.c.bf16 %v754_v3, %v753_v1  ;;  %v707_v7 = vadd.f32 %v1314_v5, %v1715_v15  ;;  %v698_v8 = vpop.f32.mrb[13].mxu1 }
 0x1e9   : > { %v699_v9 = vadd.f32 %v1715_v15, %v698_v8  ;;  %v1315_v10 = vpop.f32.mrb[14].mxu1 }
 0x1ea   : > { %1340 = vmatprep.mubr.bf16.mxu0 %v765_v6  ;;  %vm727_vm14 = vcmp.gt.f32.partialorder %v707_v7, 0.0  ;;  %v743_v11 = vmul.f32 0.01, %v707_v7  ;;  %v710_v12 = vadd.f32 %v1315_v10, %v1715_v15  ;;  %v701_v13 = vpop.f32.mrb[15].mxu1 }
 0x1eb   : > { %1341 = vmatmul.mubr.bf16.gmra.mrb[24].mxu0 %v766_v4  ;;  %vm725_vm15 = vcmp.gt.f32.partialorder %v699_v9, 0.0  ;;  %v741_v14 = vmul.f32 0.01, %v699_v9  ;;  %v702_v16 = vadd.f32 %v1715_v15, %v701_v13  ;;  %v1547_v15 = vmov 0  }
 0x1ec   : > { %vm728_vm0 = vcmp.gt.f32.partialorder %v710_v12, 0.0  ;;  %v744_v17 = vmul.f32 0.01, %v710_v12  ;;  %v759_v18 = vsel %vm727_vm14, %v707_v7, %v743_v11  ;;  %1458 = vset.pattern.permute.xlu0 %v1547_v15 }
 0x1ed   : > { %vm726_vm2 = vcmp.gt.f32.partialorder %v702_v16, 0.0  ;;  %v742_v19 = vmul.f32 0.01, %v702_v16  ;;  %v757_v20 = vsel %vm725_vm15, %v699_v9, %v741_v14  ;;  %957 = vperm.xlu0 %1458, %v954_v27  }
 0x1ee   : > { %v760_v21 = vsel %vm728_vm0, %v710_v12, %v744_v17 }
 0x1ef   : > { %v758_v22 = vsel %vm726_vm2, %v702_v16, %v742_v19  ;;  %v768_v23 = vpack.c.bf16 %v760_v21, %v759_v18 }
 0x1f0   : > { %v767_v24 = vpack.c.bf16 %v758_v22, %v757_v20 }
 0x1f2   : > { %1344 = vmatprep.mubr.bf16.mxu0 %v767_v24  ;;  %v960_v24 = vlaneseq }
 0x1f3   : > { %1345 = vmatmul.mubr.bf16.gmra.mrb[28].mxu0 %v768_v23  ;;  %v953_v23 = vld [vmem:[%s1824_s7] sm:$0x1] }
 0x1f4   : > { %v961_v26 = vshrl.u32 %v960_v24, 7 }
 0x1f6   : > { %v962_v27 = vsub.s32 0, %v961_v26 }
 0x26c   : > { %v958_v15 = vpop.permute.xlu0 %957 }
 0x2ae   : > { %v1334_v29 = vpop.f32.mrb[16].mxu0 }
 0x2af   : > { %v883_v30 = vadd.f32 %v1334_v29, %v1191_v28  ;;  %v874_v31 = vpop.f32.mrb[17].mxu0 }
 0x2b0   : > { %v875_v32 = vadd.f32 %v1191_v28, %v874_v31  ;;  %v1335_v33 = vpop.f32.mrb[18].mxu0 }
 0x2b1   : > { %v886_v34 = vadd.f32 %v1335_v33, %v1191_v28  ;;  %v877_v35 = vpop.f32.mrb[19].mxu0  ;;  %v939_v37 = vmax.f32 %v883_v30, 0.0 }
 0x2b2   : > { %v878_v36 = vadd.f32 %v1191_v28, %v877_v35  ;;  %v937_v39 = vmax.f32 %v875_v32, 0.0 }
 0x2b3   : > { %v940_v38 = vmax.f32 %v886_v34, 0.0 }
 0x2b4   : > { %v938_v40 = vmax.f32 %v878_v36, 0.0 }
 0x2b5   : > { %v1388_v41 = vpack.c.bf16 %v940_v38, %v939_v37 }
 0x2b6   : > { %v1384_v43 = vpack.c.bf16 %v938_v40, %v937_v39  ;;  %v1338_v44 = vpop.f32.mrb[20].mxu0 }
 0x2b7   : > { %v899_v45 = vadd.f32 %v1338_v44, %v1191_v28  ;;  %v890_v46 = vpop.f32.mrb[21].mxu0 }
 0x2b8   : > { %v891_v47 = vadd.f32 %v1191_v28, %v890_v46  ;;  %v1339_v48 = vpop.f32.mrb[22].mxu0  ;;  %1386 = vmatpush3.bf16.xpose.msk.msra.mxu1 %vm1739_vm4, %v1384_v43 }
 0x2b9   : > { %v902_v49 = vadd.f32 %v1339_v48, %v1191_v28  ;;  %v893_v50 = vpop.f32.mrb[23].mxu0  ;;  %1387 = vmatprep.subr.bf16.mxu1 %v1544_v25  ;;  %v943_v52 = vmax.f32 %v899_v45, 0.0 }
 0x2ba   : > { %v894_v51 = vadd.f32 %v1191_v28, %v893_v50  ;;  %v941_v54 = vmax.f32 %v891_v47, 0.0 }
 0x2bb   : > { %v944_v53 = vmax.f32 %v902_v49, 0.0 }
 0x2bc   : > { %v942_v55 = vmax.f32 %v894_v51, 0.0 }
 0x2bd   : > { %v1396_v56 = vpack.c.bf16 %v944_v53, %v943_v52 }
 0x2be   : > { %v1392_v57 = vpack.c.bf16 %v942_v55, %v941_v54  ;;  %v1342_v58 = vpop.f32.mrb[24].mxu0 }
 0x2bf   : > { %v915_v59 = vadd.f32 %v1342_v58, %v1191_v28  ;;  %v906_v60 = vpop.f32.mrb[25].mxu0 }
 0x2c0   : > { %1390 = vmatpush3.bf16.xpose.msk.msra.mxu1 %vm1739_vm4, %v1388_v41  ;;  %v907_v61 = vadd.f32 %v1191_v28, %v906_v60  ;;  %v1343_v62 = vpop.f32.mrb[26].mxu0 }
 0x2c1   : > { %v947_v63 = vmax.f32 %v915_v59, 0.0  ;;  %v918_v0 = vadd.f32 %v1343_v62, %v1191_v28  ;;  %v909_v1 = vpop.f32.mrb[27].mxu0  ;;  %1391 = vmatprep.subr.bf16.mxu1 %v1544_v25 }
 0x2c2   : > { %v945_v2 = vmax.f32 %v907_v61, 0.0  ;;  %v910_v3 = vadd.f32 %v1191_v28, %v909_v1 }
 0x2c3   : > { %v948_v4 = vmax.f32 %v918_v0, 0.0 }
 0x2c4   : > { %v946_v5 = vmax.f32 %v910_v3, 0.0 }
 0x2c5   : > { %v1404_v6 = vpack.c.bf16 %v948_v4, %v947_v63 }
 0x2c6   : > { %v1400_v7 = vpack.c.bf16 %v946_v5, %v945_v2  ;;  %v1346_v8 = vpop.f32.mrb[28].mxu0 }
 0x2c7   : > { %v931_v9 = vadd.f32 %v1346_v8, %v1191_v28  ;;  %v922_v10 = vpop.f32.mrb[29].mxu0 }
 0x2c8   : > { %1394 = vmatpush3.bf16.xpose.msk.msra.mxu1 %vm1739_vm4, %v1392_v57  ;;  %v923_v11 = vadd.f32 %v1191_v28, %v922_v10  ;;  %v1347_v12 = vpop.f32.mrb[30].mxu0 }
 0x2c9   : > { %1395 = vmatprep.subr.bf16.mxu1 %v1544_v25  ;;  %v951_v13 = vmax.f32 %v931_v9, 0.0  ;;  %v934_v14 = vadd.f32 %v1347_v12, %v1191_v28  ;;  %v925_v16 = vpop.f32.mrb[31].mxu0 }
 0x2ca   : > { %v949_v17 = vmax.f32 %v923_v11, 0.0  ;;  %v926_v18 = vadd.f32 %v1191_v28, %v925_v16  ;;  %v963_v28 = vrot.slane %v958_v15, %v962_v27 }
 0x2cb   : > { %v952_v19 = vmax.f32 %v934_v14, 0.0 }
 0x2cc   : > { %v950_v20 = vmax.f32 %v926_v18, 0.0 }
 0x2cd   : > { %v1412_v21 = vpack.c.bf16 %v952_v19, %v951_v13 }
 0x2ce   : > { %v1408_v22 = vpack.c.bf16 %v950_v20, %v949_v17 }
 0x2d0   : > { %1398 = vmatpush3.bf16.xpose.msk.msra.mxu1 %vm1739_vm4, %v1396_v56 }
 0x2d1   : > { %1399 = vmatprep.subr.bf16.mxu1 %v1544_v25 }
 0x2d8   : > { %1402 = vmatpush3.bf16.xpose.msk.msra.mxu1 %vm1739_vm4, %v1400_v7 }
 0x2d9   : > { %1403 = vmatprep.subr.bf16.mxu1 %v1544_v25 }
 0x2e0   : > { %1406 = vmatpush3.bf16.xpose.msk.msra.mxu1 %vm1739_vm4, %v1404_v6 }
 0x2e1   : > { %1407 = vmatprep.subr.bf16.mxu1 %v1544_v25 }
 0x2e8   : > { %1410 = vmatpush3.bf16.xpose.msk.msra.mxu1 %vm1739_vm4, %v1408_v22 }
 0x2e9   : > { %1411 = vmatprep.subr.bf16.mxu1 %v1544_v25 }
 0x2f0   : > { %1414 = vmatpush3.bf16.xpose.msk.msra.mxu1 %vm1739_vm4, %v1412_v21 }
 0x2f7   : > { %1381 = vmatmul.mubr.msk.f32.vlgmr.msra.gmra.mrb[16].mxu1 %vm591_vm1, %v953_v23 }
 0x3ca   : > { %v1081_v29 = vpop.f32.mrb[16].mxu1 }
 0x3cb   : > { %v1082_v25 = vadd.f32 %v1081_v29, %v963_v28  ;;  %v1382_v30 = vpop.f32.mrb[17].mxu1 }
 0x3cd   : > { %1085 = vst [vmem:[%s327_s23] sm:$0x1] %v1082_v25 }
 0x3ce   : > { %1493 = shalt.err (!%p1490_p3)
}
 0x3cf   : > { %s1494_s24 = scalar_lea.hbm %s1775_s28, 16  ;;  %s1498_s22 = scalar_lea.hbm %s1826_s9, 48 }
 0x3d0   : > { %p1495_p4 = scmp.ne.s32.totalorder %s1775_s28, %s1494_s24  ;;  %p1499_p9 = scmp.lt.u32.totalorder %s1775_s28, %s1826_s9 }
 0x3d1   : > { %p1500_p10 = scmp.lt.u32.totalorder %s1498_s22, %s1494_s24  ;;  %p1502_p12 = scmp.lt.u32.totalorder %s1494_s24, %s1775_s28 }
 0x3d2   : > { %p1496_p7 = pnand %p1495_p4, %p1637_p5 }
 0x3d3   : > { %p1501_p11 = por %p1500_p10, %p1499_p9 }
 0x3d4   : > { %p1497_p8 = pneg %p1496_p7 }
 0x3d5   : > { %p1503_p13 = por %p1502_p12, %p1501_p11 }
 0x3d7   : > { %p1504_p0 = pnand %p1503_p13, %p1497_p8 }
 0x3d9   : > { %1507 = shalt.err (!%p1504_p0)
}
 0x3da   : > { %1415 = dma.vmem_to_hbm [thread:$0]  (%p1637_p5), %s1777_s25, 16, %s1775_s28, %s1087_s29  }
 0x3db PF: > { %p1421_p1 = scmp.ge.s32.totalorder %s1542_s14, 2  ;;  %s1111_s27 = sand.u32 1, %s1530_s11  }
 0x3dc   : > { %s1112_s30 = scalar_lea.sflag [#allocation4], %s1111_s27 }
 0x3dd   : > { %p1418_p2 = pnand %p1421_p1, %p1641_p6 }
 0x3df   : > { %1525 = dma.done.wait (!%p1418_p2), %s1112_s30, 16  }
 0x3e0   : > { %1527 = vsyncadd (!%p1418_p2), %s1112_s30, 4294967280  ;;  %p21_p3 = scmp.ge.s32.totalorder %s1625_s16, 5   ;;  %s1831_s11 = smov %s1534_s12 }
 0x3e1   : > { %s1832_s12 = smov %s1538_s13  ;;  %s1833_s13 = smov %s1635_s19 }
 0x3e2   : > { %s1834_s14 = smov %s1625_s16  ;;  %23 = sbr.rel (!%p21_p3) target bundleno = 6 (0x6), region = 91 }
 0x3e9   :  { %1116 = vsyncpa [#allocation4], 1 }
 0x3ea   :  { %1118 = vsyncpa [#allocation4 + $0x1], 1 }

</bundles_post_ra>
